<compile_context>
chip_gen: v7x
topology: tpu7x:2x2x1
jax: 0.10.0
libtpu: 0.0.40
codegen_flags: <defaults>
</compile_context>

<pallas_src>
import functools

import jax
import jax.numpy as jnp
from jax.experimental import pallas as pl
from jax.experimental.pallas import tpu as pltpu


LANES = 128
BLOCK_BYTES = 4 * 1024 * 1024    # ~4 MiB per input block (8192 rows f32, 16384 rows bf16)
VMEM_LIMIT = 32 * 1024 * 1024    # 2 inputs x 2 buffers x 4 MiB = 16 MiB, 2x headroom


def _cores_per_chip():
    """Best-effort TensorCores-per-chip (2 on v7x, 1 on v5e/v6e)."""
    try:
        info = pltpu.get_tpu_info()
        for name in ("tensorcores_per_chip", "num_tensorcores", "tensor_core_count",
                     "num_cores_per_chip", "cores_per_chip", "num_cores", "core_count"):
            v = getattr(info, name, None)
            if isinstance(v, int) and v >= 1:
                return max(1, min(int(v), 2))
    except Exception:
        pass
    try:
        kind = jax.devices()[0].device_kind.lower()
        if "v7" in kind or "7x" in kind:
            return 2
    except Exception:
        pass
    return 1


def _fold_into(out_ref, sq):
    """Accumulate (rows, 128) squared errors into the resident (8, 128) output block.

    The multiple-of-8 prefix folds with pure VPU adds (vreg-shaped partial sums);
    only a tiny (<8 rows) remainder, which occurs solely for small inputs, uses a
    cross-sublane (XLU) reduce.
    """
    rows = sq.shape[0]
    main = (rows // 8) * 8
    if main:
        out_ref[...] += jnp.sum(sq[:main].reshape(-1, 8, LANES), axis=0)
    if rows != main:
        out_ref[0:1, :] += jnp.sum(sq[main:], axis=0, keepdims=True)


def _mse_sum_kernel_1core(pred_ref, targ_ref, out_ref, *, n_rows, tile_rows, num_blocks):
    j = pl.program_id(0)

    @pl.when(j == 0)
    def _():
        out_ref[...] = jnp.zeros_like(out_ref)

    def body(mask_rows):
        d = pred_ref[...].astype(jnp.float32) - targ_ref[...].astype(jnp.float32)
        sq = d * d
        if mask_rows:
            row = j * tile_rows + jax.lax.broadcasted_iota(jnp.int32, sq.shape, 0)
            sq = jnp.where(row < n_rows, sq, 0.0)
        _fold_into(out_ref, sq)

    if n_rows % tile_rows == 0:
        body(False)                 # no mask anywhere in steady state
    else:
        @pl.when(j < num_blocks - 1)
        def _():
            body(False)

        @pl.when(j == num_blocks - 1)
        def _():
            body(True)              # mask only the ragged final block


def _mse_sum_kernel_mcore(pred_ref, targ_ref, out_ref, *, n_rows, tile_rows,
                          num_blocks, blocks_per_core):
    c = pl.program_id(0)            # TensorCore split (core_parallel)
    j = pl.program_id(1)            # sequential row-block loop (arbitrary)
    blk = c * blocks_per_core + j

    @pl.when(j == 0)
    def _():
        out_ref[...] = jnp.zeros_like(out_ref)

    def body(mask_rows):
        d = pred_ref[...].astype(jnp.float32) - targ_ref[...].astype(jnp.float32)
        sq = d * d
        if mask_rows:
            row = blk * tile_rows + jax.lax.broadcasted_iota(jnp.int32, sq.shape, 0)
            sq = jnp.where(row < n_rows, sq, 0.0)
        _fold_into(out_ref, sq)

    if n_rows % tile_rows == 0:
        @pl.when(blk < num_blocks)
        def _():
            body(False)
    else:
        @pl.when(blk < num_blocks - 1)
        def _():
            body(False)

        @pl.when(blk == num_blocks - 1)
        def _():
            body(True)


def mse_loss(pred, target):
    """Equivalent of torch.nn.functional.mse_loss(pred, target) (mean)."""
    assert pred.shape == target.shape, "pred/target shapes must match"
    n_elems = pred.size
    if n_elems == 0:
        return jnp.float32(jnp.nan)

    p = pred.reshape(-1)
    t = target.reshape(-1)

    # Lane-ragged tail (< 128 elems): tiny jnp slice instead of jnp.pad, which
    # would copy BOTH full tensors through HBM on a purely mem-bound kernel.
    rem = n_elems % LANES
    n_main = n_elems - rem
    if rem:
        tail = jnp.sum((p[n_main:].astype(jnp.float32)
                        - t[n_main:].astype(jnp.float32)) ** 2)
    else:
        tail = jnp.float32(0.0)

    inv_n = 1.0 / float(n_elems)
    if n_main == 0:
        return tail * jnp.float32(inv_n)

    if rem:
        p = p[:n_main]
        t = t[:n_main]

    n_rows = n_main // LANES
    p2 = p.reshape(n_rows, LANES)
    t2 = t.reshape(n_rows, LANES)

    itemsize_p = jnp.dtype(pred.dtype).itemsize
    itemsize_t = jnp.dtype(target.dtype).itemsize
    itemsize = max(itemsize_p, itemsize_t)
    row_cap = max(8, (BLOCK_BYTES // (LANES * itemsize)) // 8 * 8)
    tile_rows = n_rows if n_rows <= row_cap else row_cap
    num_blocks = pl.cdiv(n_rows, tile_rows)

    cost = pl.CostEstimate(
        flops=3 * n_main,
        transcendentals=0,
        bytes_accessed=n_main * (itemsize_p + itemsize_t) + 2 * 8 * LANES * 4,
    )

    ncores = _cores_per_chip()
    use_multicore = (ncores > 1) and (num_blocks >= 2 * ncores)

    if use_multicore:
        blocks_per_core = pl.cdiv(num_blocks, ncores)
        kernel = functools.partial(
            _mse_sum_kernel_mcore, n_rows=n_rows, tile_rows=tile_rows,
            num_blocks=num_blocks, blocks_per_core=blocks_per_core)

        def in_map(c, j):
            # Clamp so the (rare) wasted trailing iteration never DMAs out of bounds.
            return (jnp.minimum(c * blocks_per_core + j, num_blocks - 1), 0)

        core_par = getattr(pltpu, "CORE_PARALLEL", "parallel")
        arbitrary = getattr(pltpu, "ARBITRARY", "arbitrary")

        partials = pl.pallas_call(
            kernel,
            out_shape=jax.ShapeDtypeStruct((ncores * 8, LANES), jnp.float32),
            grid_spec=pltpu.PrefetchScalarGridSpec(
                num_scalar_prefetch=0,
                grid=(ncores, blocks_per_core),
                in_specs=[pl.BlockSpec((tile_rows, LANES), in_map),
                          pl.BlockSpec((tile_rows, LANES), in_map)],
                out_specs=pl.BlockSpec((8, LANES), lambda c, j: (c, 0)),
            ),
            compiler_params=pltpu.CompilerParams(
                dimension_semantics=(core_par, arbitrary),
                vmem_limit_bytes=VMEM_LIMIT),
            cost_estimate=cost,
        )(p2, t2)
    else:
        kernel = functools.partial(
            _mse_sum_kernel_1core, n_rows=n_rows, tile_rows=tile_rows,
            num_blocks=num_blocks)

        partials = pl.pallas_call(
            kernel,
            out_shape=jax.ShapeDtypeStruct((8, LANES), jnp.float32),
            grid_spec=pltpu.PrefetchScalarGridSpec(
                num_scalar_prefetch=0,
                grid=(num_blocks,),
                in_specs=[pl.BlockSpec((tile_rows, LANES), lambda j: (j, 0)),
                          pl.BlockSpec((tile_rows, LANES), lambda j: (j, 0))],
                out_specs=pl.BlockSpec((8, LANES), lambda j: (0, 0)),
            ),
            compiler_params=pltpu.CompilerParams(
                dimension_semantics=("arbitrary",),
                vmem_limit_bytes=VMEM_LIMIT),
            cost_estimate=cost,
        )(p2, t2)

    # Single cross-lane / cross-core reduce + divide by the TRUE element count.
    return (jnp.sum(partials) + tail) * jnp.float32(inv_n)


if __name__ == "__main__":
    key = jax.random.PRNGKey(0)
    subkeys = jax.random.split(key, 10)

    def ref_mse(a, b):
        return jnp.mean((a.astype(jnp.float32) - b.astype(jnp.float32)) ** 2)

    checks = [
        ((2, 4, 16, 16), jnp.float32),   # lane-aligned, single block (the module's case)
        ((3, 5, 7), jnp.float32),        # tiny lane-ragged: pure-jnp tail path
        ((5, 130), jnp.float32),         # kernel (<8-row fold) + jnp tail
        ((8456, 128), jnp.float32),      # multi-block + masked ragged last row-block
        ((2, 4, 16, 16), jnp.bfloat16),  # native low-precision streaming
    ]

    for idx, (shape, dtype) in enumerate(checks):
        k1, k2 = jax.random.split(subkeys[idx])
        a = jax.random.normal(k1, shape, dtype=jnp.float32).astype(dtype)
        b = jax.random.normal(k2, shape, dtype=jnp.float32).astype(dtype)
        loss = mse_loss(a, b)
        jax.block_until_ready(loss)
        expect = ref_mse(a, b)
        assert jnp.allclose(loss, expect, rtol=1e-4, atol=1e-6), (shape, dtype, loss, expect)

    print("KERNEL_OK")
</pallas_src>

<mosaic_0001>
module attributes {stable_mosaic.version = 11 : i64} {
  func.func @_mse_sum_kernel_1core(%arg0: i32, %arg1: memref<16x128xf32, #tpu.memory_space<vmem>>, %arg2: memref<16x128xf32, #tpu.memory_space<vmem>>, %arg3: memref<8x128xf32, #tpu.memory_space<vmem>>) attributes {dimension_semantics = [#tpu.dimension_semantics<arbitrary>], iteration_bounds = array<i64: 1>, scalar_prefetch = 0 : i64, scratch_operands = 0 : i64, tpu.core_type = #tpu.core_type<tc>, window_params = [{transform_indices = @transform_0, window_bounds = array<i64: 16, 128>}, {transform_indices = @transform_1, window_bounds = array<i64: 16, 128>}, {pipeline_mode = #tpu.pipeline_mode<synchronous>, transform_indices = @transform_2, window_bounds = array<i64: 8, 128>}]} {
    %c0_i32 = arith.constant 0 : i32
    %0 = arith.cmpi eq, %arg0, %c0_i32 : i32
    %1 = arith.extui %0 : i1 to i32
    %c0_i32_0 = arith.constant 0 : i32
    %2 = arith.cmpi ne, %1, %c0_i32_0 : i32
    scf.if %2 {
      %cst_8 = arith.constant 0.000000e+00 : f32
      %12 = vector.broadcast %cst_8 : f32 to vector<8x128xf32>
      %c0_9 = arith.constant 0 : index
      %c0_10 = arith.constant 0 : index
      %13 = vector.load %arg3[%c0_9, %c0_10] : memref<8x128xf32, #tpu.memory_space<vmem>>, vector<8x128xf32>
      tpu.vector_store %arg3[%c0_9, %c0_10], %12 {strides = array<i32>} : memref<8x128xf32, #tpu.memory_space<vmem>>, vector<8x128xf32>,
    } else {
    }
    %c0 = arith.constant 0 : index
    %c0_1 = arith.constant 0 : index
    %3 = vector.load %arg1[%c0, %c0_1] : memref<16x128xf32, #tpu.memory_space<vmem>>, vector<16x128xf32>
    %c0_2 = arith.constant 0 : index
    %c0_3 = arith.constant 0 : index
    %4 = vector.load %arg2[%c0_2, %c0_3] : memref<16x128xf32, #tpu.memory_space<vmem>>, vector<16x128xf32>
    %5 = arith.subf %3, %4 : vector<16x128xf32>
    %6 = arith.mulf %5, %5 : vector<16x128xf32>
    %c0_4 = arith.constant 0 : index
    %c0_5 = arith.constant 0 : index
    %7 = vector.load %arg3[%c0_4, %c0_5] : memref<8x128xf32, #tpu.memory_space<vmem>>, vector<8x128xf32>
    %8 = vector.shape_cast %6 : vector<16x128xf32> to vector<2x8x128xf32>
    %cst = arith.constant dense<0.000000e+00> : vector<8x128xf32>
    %9 = vector.multi_reduction <add>, %8, %cst [0] : vector<2x8x128xf32> to vector<8x128xf32>
    %10 = arith.addf %7, %9 : vector<8x128xf32>
    %c0_6 = arith.constant 0 : index
    %c0_7 = arith.constant 0 : index
    %11 = vector.load %arg3[%c0_6, %c0_7] : memref<8x128xf32, #tpu.memory_space<vmem>>, vector<8x128xf32>
    tpu.vector_store %arg3[%c0_6, %c0_7], %10 {strides = array<i32>} : memref<8x128xf32, #tpu.memory_space<vmem>>, vector<8x128xf32>,
    return
  }
  func.func @transform_0(%arg0: i32) -> (i32, i32) {
    %c0_i32 = arith.constant 0 : i32
    %c0_i32_0 = arith.constant 0 : i32
    return %arg0, %c0_i32 : i32, i32
  }
  func.func @transform_1(%arg0: i32) -> (i32, i32) {
    %c0_i32 = arith.constant 0 : i32
    %c0_i32_0 = arith.constant 0 : i32
    return %arg0, %c0_i32 : i32, i32
  }
  func.func @transform_2(%arg0: i32) -> (i32, i32) {
    %c0_i32 = arith.constant 0 : i32
    %c0_i32_0 = arith.constant 0 : i32
    %c0_i32_1 = arith.constant 0 : i32
    return %c0_i32, %c0_i32_0 : i32, i32
  }
}

</mosaic_0001>

<bundles_post_ra>
// kernel: tpu_custom_call.1
= control target key start
LH: loop header
LB: loop body
LE: loop exit
PB: predicated region body
PF: predicated region fallthrough
CT: control target
= control target key end

     0   :  { %7 = vsyncpa [#allocation3], 0  ;;  %s207_s0 = inlined_call_operand.hbm [shape: f32[16,128], index: 0, kind: input, shape index: {}]   ;;  %s208_s1 = inlined_call_operand.hbm [shape: f32[16,128], index: 1, kind: input, shape index: {}]   ;;  %s209_s2 = inlined_call_operand.hbm [shape: f32[8,128], index: 2, kind: output, shape index: {}]  }
   0x1   :  { %8 = vsyncpa [#allocation6], 0 }
   0x2   :  { %9 = vsyncpa [#allocation4], 0  ;;  %s151_s9 = smov [#allocation2]   ;;  %s79_s13 = scalar_lea.hbm %s207_s0, 256 }
   0x3   :  { %s15_s10 = sshll.u32 %s151_s9, 4  ;;  %p80_p0 = scmp.ne.s32.totalorder %s207_s0, %s79_s13  ;;  %s16_s10 = int_to_ptr.vmem [resolvable:$true] %s15_s10 }
   0x4   :  { %p83_p1 = scmp.lt.u32.totalorder %s79_s13, %s207_s0 }
   0x6   :  { %p85_p2 = pnand %p83_p1, %p80_p0 }
   0x8   :  { %88 = shalt.err (!%p85_p2)
}
   0x9   :  { %s89_s18 = scalar_lea.vmem %s16_s10, 256  ;;  %p94_p4 = scmp.lt.s32.totalorder %s16_s10, %s16_s10 }
   0xa   :  { %p90_p3 = scmp.ne.s32.totalorder %s16_s10, %s89_s18  ;;  %p95_p5 = scmp.lt.s32.totalorder %s89_s18, %s89_s18 }
   0xc   :  { %p96_p6 = por %p95_p5, %p94_p4 }
   0xe   :  { %p97_p7 = pnand %p96_p6, %p90_p3 }
  0x10   :  { %100 = shalt.err (!%p97_p7)
}
  0x11   :  { %s152_s19 = smov 128   ;;  %s153_s20 = smov 8  }
  0x12   :  { %21 = dma.hbm_to_vmem [thread:$0]  %s207_s0, 256, %s16_s10, [#allocation3], %s152_s19, %s152_s19, %s153_s20  }
  0x13   :  { %s154_s23 = smov [#allocation5]   ;;  %s101_s27 = scalar_lea.hbm %s208_s1, 256 }
  0x14   :  { %s27_s24 = sshll.u32 %s154_s23, 4  ;;  %p102_p8 = scmp.ne.s32.totalorder %s208_s1, %s101_s27  ;;  %s28_s24 = int_to_ptr.vmem [resolvable:$true] %s27_s24 }
  0x15   :  { %p105_p9 = scmp.lt.u32.totalorder %s101_s27, %s208_s1 }
  0x17   :  { %p107_p10 = pnand %p105_p9, %p102_p8 }
  0x19   :  { %110 = shalt.err (!%p107_p10)
}
  0x1a   :  { %s111_s4 = scalar_lea.vmem %s28_s24, 256  ;;  %p116_p12 = scmp.lt.s32.totalorder %s28_s24, %s28_s24 }
  0x1b   :  { %p112_p11 = scmp.ne.s32.totalorder %s28_s24, %s111_s4  ;;  %p117_p13 = scmp.lt.s32.totalorder %s111_s4, %s111_s4 }
  0x1d   :  { %p118_p0 = por %p117_p13, %p116_p12 }
  0x1f   :  { %p119_p1 = pnand %p118_p0, %p112_p11 }
  0x21   :  { %122 = shalt.err (!%p119_p1)
}
  0x22   :  { %33 = dma.hbm_to_vmem [thread:$0]  %s208_s1, 256, %s28_s24, [#allocation6], %s152_s19, %s152_s19, %s153_s20  }
  0x23   :  { %145 = dma.done.wait [#allocation3], 256  }
  0x24   :  { %146 = vsyncadd [#allocation3], 4294967040 }
  0x25   :  { %147 = dma.done.wait [#allocation6], 256  }
  0x26   :  { %148 = vsyncadd [#allocation6], 4294967040  ;;  %v45_v0 = vld [vmem:[#allocation2] sm:$0xff]  ;;  %v46_v1 = vld [vmem:[#allocation2 + $0x8] sm:$0xff]  ;;  %s155_s6 = smov [#allocation7]  }
  0x27   :  { %v47_v2 = vld [vmem:[#allocation5] sm:$0xff]  ;;  %v48_v3 = vld [vmem:[#allocation5 + $0x8] sm:$0xff]  ;;  %s63_s7 = sshll.u32 %s155_s6, 4  ;;  %s64_s7 = int_to_ptr.vmem [resolvable:$true] %s63_s7 }
  0x28   :  { %v49_v4 = vsub.f32 %v45_v0, %v47_v2  ;;  %v50_v5 = vsub.f32 %v46_v1, %v48_v3  ;;  %s123_s8 = scalar_lea.vmem %s64_s7, 128  ;;  %p128_p3 = scmp.lt.s32.totalorder %s64_s7, %s64_s7 }
  0x29   :  { %p124_p2 = scmp.ne.s32.totalorder %s64_s7, %s123_s8  ;;  %p129_p4 = scmp.lt.s32.totalorder %s123_s8, %s123_s8 }
  0x2a   :  { %v51_v6 = vmul.f32 %v49_v4, %v49_v4  ;;  %v52_v7 = vmul.f32 %v50_v5, %v50_v5 }
  0x2b   :  { %p130_p5 = por %p129_p4, %p128_p3 }
  0x2c   :  { %v54_v8 = vadd.f32 %v52_v7, %v51_v6 }
  0x2d   :  { %p131_p6 = pnand %p130_p5, %p124_p2 }
  0x2e   :  { %56 = vst [vmem:[#allocation7] sm:$0xff] %v54_v8 }
  0x2f   :  { %134 = shalt.err (!%p131_p6)
}
  0x30   :  { %s135_s10 = scalar_lea.hbm %s209_s2, 128 }
  0x31   :  { %p136_p7 = scmp.ne.s32.totalorder %s209_s2, %s135_s10  ;;  %p139_p8 = scmp.lt.u32.totalorder %s135_s10, %s209_s2 }
  0x33   :  { %p141_p9 = pnand %p139_p8, %p136_p7 }
  0x35   :  { %144 = shalt.err (!%p141_p9)
}
  0x36   :  { %66 = dma.vmem_to_hbm [thread:$0]  %s64_s7, 128, %s209_s2, [#allocation4]  }
  0x37   :  { %149 = dma.done.wait [#allocation4], 128  }
  0x38   :  { %150 = vsyncadd [#allocation4], 4294967168 }
  0x39   :  { %70 = vsyncpa [#allocation3], 1 }
  0x3a   :  { %71 = vsyncpa [#allocation6], 1 }
  0x3b   :  { %72 = vsyncpa [#allocation4], 1 }

</bundles_post_ra>
